<compile_context>
chip_gen: v5e
topology: v5e:2x2
jax: 0.10.0
libtpu: 0.0.40
codegen_flags: <defaults>
</compile_context>

<pallas_src>
import jax
import jax.numpy as jnp
from jax.experimental import pallas as pl
from jax.experimental.pallas import tpu as pltpu


def _round_up(x, m):
    return ((x + m - 1) // m) * m


def _xw_t(x, w):
    # x: (tb, tk), w: (tn, tk) in nn.Linear (V, K) layout.
    # Contract the K (last) dims of both -> (tb, tn), f32 accumulation.
    return jax.lax.dot_general(
        x, w,
        dimension_numbers=(((1,), (1,)), ((), ())),
        preferred_element_type=jnp.float32,
    )


def linear_mask_kernel_single_k(x_ref, w_ref, bm_ref, o_ref):
    # Fast path: whole K in one tile -> no accumulator scratch, no pl.when.
    acc = _xw_t(x_ref[...], w_ref[...])
    bias = bm_ref[0:1, :]          # (1, tn) broadcast over batch rows
    mask = bm_ref[1:2, :]          # (1, tn)
    o_ref[...] = ((acc + bias) * mask).astype(o_ref.dtype)


def linear_mask_kernel_multi_k(x_ref, w_ref, bm_ref, o_ref, acc_ref):
    # x_ref  : (tb, tk)  input rows (compute dtype)
    # w_ref  : (tn, tk)  weight tile in nn.Linear (V, K) layout (no transpose)
    # bm_ref : (2, tn)   row 0 = bias, row 1 = mask (f32)
    # o_ref  : (tb, tn)  output tile
    # acc_ref: (tb, tn)  f32 accumulator scratch, resident across the K axis
    k = pl.program_id(2)

    @pl.when(k == 0)
    def _init():
        acc_ref[...] = jnp.zeros_like(acc_ref)

    acc_ref[...] += _xw_t(x_ref[...], w_ref[...])

    @pl.when(k == pl.num_programs(2) - 1)
    def _finalize():
        bias = bm_ref[0:1, :]
        mask = bm_ref[1:2, :]
        o_ref[...] = ((acc_ref[...] + bias) * mask).astype(o_ref.dtype)


def prepare_linear_mask_params(weight, bias, mask, *, tn, tk,
                               compute_dtype=None):
    """One-time parameter prep (keep OUT of the per-call jitted path).

    weight: (V, K) as in nn.Linear; bias, mask: (V,).
    Pads V->Vp (multiple of tn, lane-dense) and K->Kp (multiple of tk), keeps
    the (V, K) layout (no transpose), and packs bias+mask into one (2, Vp)
    f32 slab.  Zero-padded K columns contribute nothing; padded V columns are
    sliced off after the call.
    """
    V, K = weight.shape
    Vp = _round_up(V, tn)
    Kp = _round_up(K, tk)
    if compute_dtype is not None:
        weight = weight.astype(compute_dtype)      # e.g. bf16 on v6e/v7x
    w_pad = jnp.pad(weight, ((0, Vp - V), (0, Kp - K)))
    bm = jnp.stack(
        [jnp.pad(bias.astype(jnp.float32), (0, Vp - V)),
         jnp.pad(mask.astype(jnp.float32), (0, Vp - V))],
        axis=0,
    )                                              # (2, Vp)
    return w_pad, bm


def linear_mask_apply(x, w_pad, bm, *, out_features, tb, tn, tk,
                      compute_dtype=None):
    """z = (x @ W.T + b) * mask with pre-padded / packed parameters."""
    B, K = x.shape
    Vp, Kp = w_pad.shape
    out_dtype = x.dtype

    if compute_dtype is not None:
        x = x.astype(compute_dtype)

    Bp = _round_up(B, tb)
    if Bp != B or Kp != K:
        x = jnp.pad(x, ((0, Bp - B), (0, Kp - K)))

    x_spec = pl.BlockSpec((tb, tk), lambda i, j, k=0: (i, k))
    w_spec = pl.BlockSpec((tn, tk), lambda i, j, k=0: (j, k))
    bm_spec = pl.BlockSpec((2, tn), lambda i, j, k=0: (0, j))
    o_spec = pl.BlockSpec((tb, tn), lambda i, j, k=0: (i, j))

    if Kp == tk:
        # Single K tile: no reduction axis, no accumulator scratch.
        grid = (Bp // tb, Vp // tn)
        out = pl.pallas_call(
            linear_mask_kernel_single_k,
            out_shape=jax.ShapeDtypeStruct((Bp, Vp), out_dtype),
            grid_spec=pltpu.PrefetchScalarGridSpec(
                num_scalar_prefetch=0,
                grid=grid,
                in_specs=[
                    pl.BlockSpec((tb, tk), lambda i, j: (i, 0)),
                    pl.BlockSpec((tn, tk), lambda i, j: (j, 0)),
                    pl.BlockSpec((2, tn), lambda i, j: (0, j)),
                ],
                out_specs=pl.BlockSpec((tb, tn), lambda i, j: (i, j)),
            ),
            compiler_params=pltpu.CompilerParams(
                dimension_semantics=("parallel", "parallel")),
        )(x, w_pad, bm)
    else:
        grid = (Bp // tb, Vp // tn, Kp // tk)   # reduction (K) axis last
        out = pl.pallas_call(
            linear_mask_kernel_multi_k,
            out_shape=jax.ShapeDtypeStruct((Bp, Vp), out_dtype),
            grid_spec=pltpu.PrefetchScalarGridSpec(
                num_scalar_prefetch=0,
                grid=grid,
                in_specs=[
                    pl.BlockSpec((tb, tk), lambda i, j, k: (i, k)),   # x tile
                    pl.BlockSpec((tn, tk), lambda i, j, k: (j, k)),   # W tile
                    pl.BlockSpec((2, tn), lambda i, j, k: (0, j)),    # bias+mask
                ],
                out_specs=pl.BlockSpec((tb, tn), lambda i, j, k: (i, j)),
                scratch_shapes=[pltpu.VMEM((tb, tn), jnp.float32)],
            ),
            compiler_params=pltpu.CompilerParams(
                dimension_semantics=("parallel", "parallel", "arbitrary")),
        )(x, w_pad, bm)

    return out[:B, :out_features]


def linear_mask(x, weight, bias, mask, *, tb=None, tn=None, tk=None,
                compute_dtype=None):
    """Convenience wrapper: prep params + apply.  x: (B, K); weight: (V, K)."""
    B, K = x.shape
    V = weight.shape[0]
    # Tile choices: lane-dense N tile (multiple of 128, up to 256), K tile up
    # to 512, batch tile up to 512 rows (multiple of 8) so large batches get
    # several pipelined / parallel grid steps.
    if tn is None:
        tn = min(256, _round_up(V, 128))
    if tk is None:
        tk = min(512, _round_up(K, 128))
    if tb is None:
        tb = min(512, _round_up(B, 8))
    w_pad, bm = prepare_linear_mask_params(
        weight, bias, mask, tn=tn, tk=tk, compute_dtype=compute_dtype)
    return linear_mask_apply(
        x, w_pad, bm, out_features=V, tb=tb, tn=tn, tk=tk,
        compute_dtype=compute_dtype)


if __name__ == "__main__":
    key = jax.random.PRNGKey(0)

    # --- primary small test: Linear(in_channels=32, v=64), batch=8 ----------
    B, K, V = 8, 32, 64
    kx, kw, kb = jax.random.split(key, 3)

    x = jax.random.normal(kx, (B, K), dtype=jnp.float32)
    bound = 1.0 / (K ** 0.5)
    weight = jax.random.uniform(kw, (V, K), minval=-bound, maxval=bound,
                                dtype=jnp.float32)
    bias = jax.random.uniform(kb, (V,), minval=-bound, maxval=bound,
                              dtype=jnp.float32)
    mask = jnp.ones((V,), dtype=jnp.float32)   # self.mask = torch.ones(v)

    out = linear_mask(x, weight, bias, mask)   # f32, single-K fast path
    out = jax.block_until_ready(out)

    ref = (x @ weight.T + bias) * mask
    assert out.shape == (B, V)
    assert jnp.allclose(out, ref, atol=1e-5, rtol=1e-5)

    # --- secondary test: exercise the multi-K reduction path + padding ------
    B2, K2, V2 = 16, 300, 200
    kx2, kw2, kb2 = jax.random.split(jax.random.PRNGKey(1), 3)
    x2 = jax.random.normal(kx2, (B2, K2), dtype=jnp.float32)
    b2 = 1.0 / (K2 ** 0.5)
    w2 = jax.random.uniform(kw2, (V2, K2), minval=-b2, maxval=b2,
                            dtype=jnp.float32)
    bb2 = jax.random.uniform(kb2, (V2,), minval=-b2, maxval=b2,
                             dtype=jnp.float32)
    m2 = jnp.ones((V2,), dtype=jnp.float32)

    out2 = linear_mask(x2, w2, bb2, m2, tk=128)   # Kp=384 -> 3 K steps
    out2 = jax.block_until_ready(out2)
    ref2 = (x2 @ w2.T + bb2) * m2
    assert out2.shape == (B2, V2)
    assert jnp.allclose(out2, ref2, atol=1e-4, rtol=1e-4)

    print("KERNEL_OK")
</pallas_src>

<mosaic_0001>
module attributes {stable_mosaic.version = 11 : i64} {
  func.func @linear_mask_kernel_single_k(%arg0: i32, %arg1: i32, %arg2: memref<8x128xf32, #tpu.memory_space<vmem>>, %arg3: memref<128x128xf32, #tpu.memory_space<vmem>>, %arg4: memref<2x128xf32, #tpu.memory_space<vmem>>, %arg5: memref<8x128xf32, #tpu.memory_space<vmem>>) attributes {dimension_semantics = [#tpu.dimension_semantics<parallel>, #tpu.dimension_semantics<parallel>], iteration_bounds = array<i64: 1, 1>, scalar_prefetch = 0 : i64, scratch_operands = 0 : i64, tpu.core_type = #tpu.core_type<tc>, window_params = [{transform_indices = @transform_0, window_bounds = array<i64: 8, 128>}, {transform_indices = @transform_1, window_bounds = array<i64: 128, 128>}, {transform_indices = @transform_2, window_bounds = array<i64: 2, 128>}, {transform_indices = @transform_3, window_bounds = array<i64: 8, 128>}]} {
    %c0 = arith.constant 0 : index
    %c0_0 = arith.constant 0 : index
    %0 = vector.load %arg2[%c0, %c0_0] : memref<8x128xf32, #tpu.memory_space<vmem>>, vector<8x128xf32>
    %c0_1 = arith.constant 0 : index
    %c0_2 = arith.constant 0 : index
    %1 = vector.load %arg3[%c0_1, %c0_2] : memref<128x128xf32, #tpu.memory_space<vmem>>, vector<128x128xf32>
    %cst = arith.constant dense<0.000000e+00> : vector<8x128xf32>
    %2 = tpu.matmul %0, %1, %cst {dimension_numbers = #tpu.dot_dimension_numbers<[1], [1], [0], [0], [0, 0, 1, 0], [], []>} : vector<8x128xf32>, vector<128x128xf32>, vector<8x128xf32> -> vector<8x128xf32>
    %c0_3 = arith.constant 0 : index
    %c0_4 = arith.constant 0 : index
    %3 = vector.load %arg4[%c0_3, %c0_4] : memref<2x128xf32, #tpu.memory_space<vmem>>, vector<1x128xf32>
    %c1 = arith.constant 1 : index
    %c0_5 = arith.constant 0 : index
    %4 = vector.load %arg4[%c1, %c0_5] : memref<2x128xf32, #tpu.memory_space<vmem>>, vector<1x128xf32>
    %5 = vector.broadcast %3 : vector<1x128xf32> to vector<8x128xf32>
    %6 = arith.addf %2, %5 : vector<8x128xf32>
    %7 = vector.broadcast %4 : vector<1x128xf32> to vector<8x128xf32>
    %8 = arith.mulf %6, %7 : vector<8x128xf32>
    %c0_6 = arith.constant 0 : index
    %c0_7 = arith.constant 0 : index
    %9 = vector.load %arg5[%c0_6, %c0_7] : memref<8x128xf32, #tpu.memory_space<vmem>>, vector<8x128xf32>
    tpu.vector_store %arg5[%c0_6, %c0_7], %8 {strides = array<i32>} : memref<8x128xf32, #tpu.memory_space<vmem>>, vector<8x128xf32>,
    return
  }
  func.func @transform_0(%arg0: i32, %arg1: i32) -> (i32, i32) {
    %c0_i32 = arith.constant 0 : i32
    %c0_i32_0 = arith.constant 0 : i32
    return %arg0, %c0_i32 : i32, i32
  }
  func.func @transform_1(%arg0: i32, %arg1: i32) -> (i32, i32) {
    %c0_i32 = arith.constant 0 : i32
    %c0_i32_0 = arith.constant 0 : i32
    return %arg1, %c0_i32 : i32, i32
  }
  func.func @transform_2(%arg0: i32, %arg1: i32) -> (i32, i32) {
    %c0_i32 = arith.constant 0 : i32
    %c0_i32_0 = arith.constant 0 : i32
    return %c0_i32, %arg1 : i32, i32
  }
  func.func @transform_3(%arg0: i32, %arg1: i32) -> (i32, i32) {
    %c0_i32 = arith.constant 0 : i32
    return %arg0, %arg1 : i32, i32
  }
}

</mosaic_0001>

<bundles_post_ra>
// kernel: tpu_custom_call.1
= control target key start
LH: loop header
LB: loop body
LE: loop exit
PB: predicated region body
PF: predicated region fallthrough
CT: control target
= control target key end

     0   :  { %8 = vsyncpa [#allocation3], 0  ;;  %s267_s0 = inlined_call_operand.hbm [shape: f32[8,128], index: 0, kind: input, shape index: {}]   ;;  %s268_s1 = inlined_call_operand.hbm [shape: f32[128,128], index: 1, kind: input, shape index: {}]   ;;  %s269_s2 = inlined_call_operand.hbm [shape: f32[2,128], index: 2, kind: input, shape index: {}]   ;;  %s270_s3 = inlined_call_operand.hbm [shape: f32[8,128], index: 3, kind: output, shape index: {}]  }
   0x1   :  { %9 = vsyncpa [#allocation6], 0  ;;  %s26_s14 = sshll.u32 %s268_s1, 4  ;;  %s27_s14 = int_to_ptr.hbm [resolvable:$true] %s26_s14 }
   0x2   :  { %10 = vsyncpa [#allocation4], 0  ;;  %s229_s15 = smov [#allocation5]   ;;  %s16_s19 = sshll.u32 %s267_s0, 4  ;;  %s17_s19 = int_to_ptr.hbm [resolvable:$true] %s16_s19 }
   0x3   :  { %s28_s16 = sshll.u32 %s229_s15, 4  ;;  %s230_s20 = smov 128   ;;  %s29_s16 = int_to_ptr.vmem [resolvable:$true] %s28_s16 }
   0x4   :  { %s231_s21 = smov 8   ;;  %s232_s22 = smov [#allocation2]  }
   0x5   :  { %34 = dma.hbm_to_vmem [thread:$0]  %s27_s14, 2048, %s29_s16, [#allocation6], %s230_s20, %s230_s20, %s231_s21  }
   0x6   :  { %s18_s23 = sshll.u32 %s232_s22, 4  ;;  %s40_s26 = sshll.u32 %s269_s2, 4  ;;  %s19_s23 = int_to_ptr.vmem [resolvable:$true] %s18_s23  ;;  %s41_s26 = int_to_ptr.hbm [resolvable:$true] %s40_s26 }
   0x7   :  { %21 = dma.hbm_to_vmem [thread:$0]  %s17_s19, 128, %s19_s23, [#allocation3]  }
   0x8   :  { %s233_s1 = smov [#allocation7]  }
   0x9   :  { %s42_s27 = sshll.u32 %s233_s1, 4  ;;  %s43_s27 = int_to_ptr.vmem [resolvable:$true] %s42_s27 }
   0xa   :  { %45 = dma.hbm_to_vmem [thread:$0]  %s41_s26, 32, %s43_s27, [#allocation6]  }
   0xb   :  { %223 = dma.done.wait [#allocation3], 128  }
   0xc   :  { %224 = vsyncadd [#allocation3], 4294967168 }
   0xd   :  { %225 = dma.done.wait [#allocation6], 2080  }
   0xe   :  { %226 = vsyncadd [#allocation6], 4294965216  ;;  %v74_v0 = vld [vmem:[#allocation5 + $0x78] sm:$0xff]  ;;  %v73_v1 = vld [vmem:[#allocation5 + $0x70] sm:$0xff]  ;;  %s234_s0 = smov [#allocation8]   ;;  %s108_s30 = sshll.u32 %s270_s3, 4  ;;  %s109_s30 = int_to_ptr.hbm [resolvable:$true] %s108_s30 }
   0xf   :  { %78 = vmatpush.xpose.msra.mxu0 %v74_v0  ;;  %v72_v2 = vld [vmem:[#allocation5 + $0x68] sm:$0xff]  ;;  %v71_v3 = vld [vmem:[#allocation5 + $0x60] sm:$0xff]  ;;  %v70_v4 = vld [vmem:[#allocation5 + $0x58] sm:$0xff]  ;;  %s106_s2 = sshll.u32 %s234_s0, 4  ;;  %s107_s2 = int_to_ptr.vmem [resolvable:$true] %s106_s2 }
  0x10   :  { %v69_v5 = vld [vmem:[#allocation5 + $0x50] sm:$0xff]  ;;  %v68_v6 = vld [vmem:[#allocation5 + $0x48] sm:$0xff]  ;;  %v67_v7 = vld [vmem:[#allocation5 + $0x40] sm:$0xff] }
  0x11   :  { %v66_v8 = vld [vmem:[#allocation5 + $0x38] sm:$0xff]  ;;  %v65_v9 = vld [vmem:[#allocation5 + $0x30] sm:$0xff]  ;;  %v64_v10 = vld [vmem:[#allocation5 + $0x28] sm:$0xff] }
  0x12   :  { %v63_v11 = vld [vmem:[#allocation5 + $0x20] sm:$0xff]  ;;  %v62_v12 = vld [vmem:[#allocation5 + $0x18] sm:$0xff]  ;;  %v61_v13 = vld [vmem:[#allocation5 + $0x10] sm:$0xff] }
  0x13   :  { %79 = vmatpush.xpose.msra.mxu0 %v73_v1  ;;  %v60_v14 = vld [vmem:[#allocation5 + $0x8] sm:$0xff]  ;;  %v59_v15 = vld [vmem:[#allocation5] sm:$0xff]  ;;  %v58_v16 = vld [vmem:[#allocation2] sm:$0xff] }
  0x14   :  { %v125_v17 = vld [vmem:[#allocation7] ss:$0 sm:$0xff]  ;;  %v126_v18 = vld [vmem:[#allocation7 + $0x1] ss:$0 sm:$0xff] }
  0x17   :  { %80 = vmatpush.xpose.msra.mxu0 %v72_v2 }
  0x1b   :  { %81 = vmatpush.xpose.msra.mxu0 %v71_v3 }
  0x1f   :  { %82 = vmatpush.xpose.msra.mxu0 %v70_v4 }
  0x23   :  { %83 = vmatpush.xpose.msra.mxu0 %v69_v5 }
  0x27   :  { %84 = vmatpush.xpose.msra.mxu0 %v68_v6 }
  0x2b   :  { %85 = vmatpush.xpose.msra.mxu0 %v67_v7 }
  0x2f   :  { %86 = vmatpush.xpose.msra.mxu0 %v66_v8 }
  0x33   :  { %87 = vmatpush.xpose.msra.mxu0 %v65_v9 }
  0x37   :  { %88 = vmatpush.xpose.msra.mxu0 %v64_v10 }
  0x3b   :  { %89 = vmatpush.xpose.msra.mxu0 %v63_v11 }
  0x3f   :  { %90 = vmatpush.xpose.msra.mxu0 %v62_v12 }
  0x43   :  { %91 = vmatpush.xpose.msra.mxu0 %v61_v13 }
  0x47   :  { %92 = vmatpush.xpose.msra.mxu0 %v60_v14 }
  0x4b   :  { %93 = vmatpush.xpose.msra.mxu0 %v59_v15 }
  0x4e   :  { %94 = vmatmul.f32.vlgmr.msra.gmra.mxu0 %v58_v16 }
  0xcb   :  { %v95_v19 = vpop.f32.mrf.mxu0 }
  0xcc   :  { %v96_v20 = vadd.f32 %v125_v17, %v95_v19 }
  0xce   :  { %v99_v21 = vmul.f32 %v126_v18, %v96_v20 }
  0xd0   :  { %100 = vst [vmem:[#allocation8] sm:$0xff] %v99_v21 }
  0xd1   :  { %111 = dma.vmem_to_hbm [thread:$0]  %s107_s2, 128, %s109_s30, [#allocation4]  }
  0xd2   :  { %227 = dma.done.wait [#allocation4], 128  }
  0xd3   :  { %228 = vsyncadd [#allocation4], 4294967168 }
  0xd4   :  { %116 = vsyncpa [#allocation3], 1 }
  0xd5   :  { %117 = vsyncpa [#allocation6], 1 }
  0xd6   :  { %118 = vsyncpa [#allocation4], 1 }

</bundles_post_ra>
